<compile_context>
chip_gen: v5e
topology: v5e:2x2
jax: 0.10.0
libtpu: 0.0.40
codegen_flags: <defaults>
</compile_context>

<pallas_src>
import math

import jax
import jax.numpy as jnp
from jax.experimental import pallas as pl
from jax.experimental.pallas import tpu as pltpu

IN_DIM = 28 * 28      # 784
H1 = 128
H2 = 64
OUT_DIM = 10
OUT_PAD = 128         # lane-dense padded output width (full unmasked vst)
TILE_B_MAX = 2048     # ~14 MiB VMEM double-buffered with f32 x; fits all gens
                      # with vmem_limit_bytes=32 MiB


def _round_up(n, m):
    return (n + m - 1) // m * m


def _pick_tile_b(batch):
    """Batch tile: multiple of 8, <= TILE_B_MAX, minimal ragged waste, and
    >= 2 grid steps whenever the batch is big enough to split across
    v7x's two TensorCores (the batch axis is marked "parallel")."""
    if batch <= 256:
        return _round_up(max(batch, 8), 8)
    n_tiles = max(2, -(-batch // TILE_B_MAX))
    return _round_up(-(-batch // n_tiles), 8)


def _mlp_kernel(x_ref, w1_ref, b1_ref, w2_ref, b2_ref, w3_ref, b3_ref, o_ref):
    # fc1 + ReLU: x streamed as f32 from HBM, cast to bf16 right before the
    # MXU dot (bf16 x bf16 -> f32 accumulation).
    x_bf16 = x_ref[...].astype(jnp.bfloat16)
    h1 = jnp.dot(x_bf16, w1_ref[...], preferred_element_type=jnp.float32)
    h1 = jnp.maximum(h1 + b1_ref[...], 0.0)
    # fc2 + ReLU: kept fully f32 (tiny matmul, MXU is idle anyway).
    h2 = jnp.dot(h1, w2_ref[...], preferred_element_type=jnp.float32)
    h2 = jnp.maximum(h2 + b2_ref[...], 0.0)
    # fc3 logits, lane-padded to 128 columns; bf16 writeback halves the
    # output HBM stream.
    out = jnp.dot(h2, w3_ref[...], preferred_element_type=jnp.float32)
    o_ref[...] = (out + b3_ref[...]).astype(o_ref.dtype)


def neural_network_forward(x, params):
    """x: any shape flattening to (-1, 784), like PyTorch x.view(-1, 28*28)."""
    w1, b1, w2, b2, w3, b3 = params
    x2d = x.reshape(-1, IN_DIM).astype(jnp.float32)   # no extra pad/cast pass
    batch = x2d.shape[0]

    tile_b = _pick_tile_b(batch)
    grid = (pl.cdiv(batch, tile_b),)   # final partial block is masked by Pallas

    # Resident weights: w1 streamed once in bf16 (MXU-native); fc2/fc3 stay f32
    # for numerics (they are tiny). fc3 is zero-padded 10 -> 128 output lanes.
    w1b = w1.astype(jnp.bfloat16)
    b1f = b1.astype(jnp.float32)
    w2f = w2.astype(jnp.float32)
    b2f = b2.astype(jnp.float32)
    w3p = jnp.zeros((H2, OUT_PAD), jnp.float32).at[:, :OUT_DIM].set(
        w3.astype(jnp.float32))
    b3p = jnp.zeros((1, OUT_PAD), jnp.float32).at[:, :OUT_DIM].set(
        b3.astype(jnp.float32))

    out_padded = pl.pallas_call(
        _mlp_kernel,
        out_shape=jax.ShapeDtypeStruct((batch, OUT_PAD), jnp.bfloat16),
        grid=grid,
        in_specs=[
            pl.BlockSpec((tile_b, IN_DIM), lambda i: (i, 0)),   # x tile (f32)
            pl.BlockSpec((IN_DIM, H1),     lambda i: (0, 0)),   # w1 (bf16, resident)
            pl.BlockSpec((1, H1),          lambda i: (0, 0)),   # b1
            pl.BlockSpec((H1, H2),         lambda i: (0, 0)),   # w2
            pl.BlockSpec((1, H2),          lambda i: (0, 0)),   # b2
            pl.BlockSpec((H2, OUT_PAD),    lambda i: (0, 0)),   # w3 (padded)
            pl.BlockSpec((1, OUT_PAD),     lambda i: (0, 0)),   # b3 (padded)
        ],
        out_specs=pl.BlockSpec((tile_b, OUT_PAD), lambda i: (i, 0)),
        compiler_params=pltpu.CompilerParams(
            dimension_semantics=("parallel",),      # shards tiles on v7x's 2 TCs
            vmem_limit_bytes=32 * 1024 * 1024,      # headroom for 2048-row tiles
        ),
    )(x2d, w1b, b1f, w2f, b2f, w3p, b3p)

    # TODO(synk): consumers that can read the padded (B, 128) bf16 logits
    # directly (e.g. argmax over [:, :10]) can skip this slice/upcast pass.
    return out_padded[:, :OUT_DIM].astype(jnp.float32)


def init_params(key):
    """Deterministic init mimicking nn.Linear's default U(-1/sqrt(fan_in), ...)."""
    def linear(key, fan_in, fan_out):
        kw, kb = jax.random.split(key)
        bound = 1.0 / math.sqrt(fan_in)
        # Stored as (in, out) so kernel does x @ W (== PyTorch x @ W.T).
        w = jax.random.uniform(kw, (fan_in, fan_out), jnp.float32, -bound, bound)
        b = jax.random.uniform(kb, (1, fan_out), jnp.float32, -bound, bound)
        return w, b

    k1, k2, k3 = jax.random.split(key, 3)
    w1, b1 = linear(k1, IN_DIM, H1)
    w2, b2 = linear(k2, H1, H2)
    w3, b3 = linear(k3, H2, OUT_DIM)
    return (w1, b1, w2, b2, w3, b3)


def reference_forward(x, params):
    """Pure-JAX f32 reference for correctness check."""
    w1, b1, w2, b2, w3, b3 = params
    x2d = x.reshape(-1, IN_DIM).astype(jnp.float32)
    h1 = jnp.maximum(x2d @ w1 + b1, 0.0)
    h2 = jnp.maximum(h1 @ w2 + b2, 0.0)
    return h2 @ w3 + b3


if __name__ == "__main__":
    key = jax.random.PRNGKey(0)
    kp, kx = jax.random.split(key)

    params = init_params(kp)

    # Small batch of MNIST-shaped images, NCHW like the PyTorch DataLoader.
    x = jax.random.normal(kx, (8, 1, 28, 28), jnp.float32)
    out = jax.block_until_ready(neural_network_forward(x, params))
    ref = reference_forward(x, params)
    assert out.shape == (8, 10)
    # bf16 x/w1 on fc1 and bf16 output store vs f32 reference -> loose tolerance.
    assert jnp.allclose(out, ref, atol=3e-2, rtol=3e-2)

    # Ragged, multi-tile batch to exercise the adaptive tile + partial-block path.
    kx2, _ = jax.random.split(kx)
    x_big = jax.random.normal(kx2, (600, 1, 28, 28), jnp.float32)
    out_big = jax.block_until_ready(neural_network_forward(x_big, params))
    ref_big = reference_forward(x_big, params)
    assert out_big.shape == (600, 10)
    assert jnp.allclose(out_big, ref_big, atol=3e-2, rtol=3e-2)

    print("KERNEL_OK")
</pallas_src>

<mosaic_0001>
module attributes {stable_mosaic.version = 11 : i64} {
  func.func @_mlp_kernel(%arg0: i32, %arg1: memref<8x784xf32, #tpu.memory_space<vmem>>, %arg2: memref<784x128xbf16, #tpu.memory_space<vmem>>, %arg3: memref<1x128xf32, #tpu.memory_space<vmem>>, %arg4: memref<128x64xf32, #tpu.memory_space<vmem>>, %arg5: memref<1x64xf32, #tpu.memory_space<vmem>>, %arg6: memref<64x128xf32, #tpu.memory_space<vmem>>, %arg7: memref<1x128xf32, #tpu.memory_space<vmem>>, %arg8: memref<8x128xbf16, #tpu.memory_space<vmem>>) attributes {dimension_semantics = [#tpu.dimension_semantics<parallel>], iteration_bounds = array<i64: 1>, scalar_prefetch = 0 : i64, scratch_operands = 0 : i64, tpu.core_type = #tpu.core_type<tc>, window_params = [{transform_indices = @transform_0, window_bounds = array<i64: 8, 784>}, {pipeline_mode = #tpu.pipeline_mode<synchronous>, transform_indices = @transform_1, window_bounds = array<i64: 784, 128>}, {pipeline_mode = #tpu.pipeline_mode<synchronous>, transform_indices = @transform_2, window_bounds = array<i64: 1, 128>}, {pipeline_mode = #tpu.pipeline_mode<synchronous>, transform_indices = @transform_3, window_bounds = array<i64: 128, 64>}, {pipeline_mode = #tpu.pipeline_mode<synchronous>, transform_indices = @transform_4, window_bounds = array<i64: 1, 64>}, {pipeline_mode = #tpu.pipeline_mode<synchronous>, transform_indices = @transform_5, window_bounds = array<i64: 64, 128>}, {pipeline_mode = #tpu.pipeline_mode<synchronous>, transform_indices = @transform_6, window_bounds = array<i64: 1, 128>}, {transform_indices = @transform_7, window_bounds = array<i64: 8, 128>}]} {
    %c0 = arith.constant 0 : index
    %c0_0 = arith.constant 0 : index
    %0 = vector.load %arg1[%c0, %c0_0] : memref<8x784xf32, #tpu.memory_space<vmem>>, vector<8x784xf32>
    %1 = arith.truncf %0 : vector<8x784xf32> to vector<8x784xbf16>
    %c0_1 = arith.constant 0 : index
    %c0_2 = arith.constant 0 : index
    %2 = vector.load %arg2[%c0_1, %c0_2] : memref<784x128xbf16, #tpu.memory_space<vmem>>, vector<784x128xbf16>
    %cst = arith.constant dense<0.000000e+00> : vector<8x128xf32>
    %3 = tpu.matmul %1, %2, %cst {dimension_numbers = #tpu.dot_dimension_numbers<[1], [0], [0], [1], [0, 0, 1, 1], [], []>} : vector<8x784xbf16>, vector<784x128xbf16>, vector<8x128xf32> -> vector<8x128xf32>
    %c0_3 = arith.constant 0 : index
    %c0_4 = arith.constant 0 : index
    %4 = vector.load %arg3[%c0_3, %c0_4] : memref<1x128xf32, #tpu.memory_space<vmem>>, vector<1x128xf32>
    %5 = vector.broadcast %4 : vector<1x128xf32> to vector<8x128xf32>
    %6 = arith.addf %3, %5 : vector<8x128xf32>
    %cst_5 = arith.constant 0.000000e+00 : f32
    %7 = vector.broadcast %cst_5 : f32 to vector<8x128xf32>
    %8 = arith.maximumf %6, %7 : vector<8x128xf32>
    %c0_6 = arith.constant 0 : index
    %c0_7 = arith.constant 0 : index
    %9 = vector.load %arg4[%c0_6, %c0_7] : memref<128x64xf32, #tpu.memory_space<vmem>>, vector<128x64xf32>
    %cst_8 = arith.constant dense<0.000000e+00> : vector<8x64xf32>
    %10 = tpu.matmul %8, %9, %cst_8 {dimension_numbers = #tpu.dot_dimension_numbers<[1], [0], [0], [1], [0, 0, 1, 1], [], []>} : vector<8x128xf32>, vector<128x64xf32>, vector<8x64xf32> -> vector<8x64xf32>
    %c0_9 = arith.constant 0 : index
    %c0_10 = arith.constant 0 : index
    %11 = vector.load %arg5[%c0_9, %c0_10] : memref<1x64xf32, #tpu.memory_space<vmem>>, vector<1x64xf32>
    %12 = vector.broadcast %11 : vector<1x64xf32> to vector<8x64xf32>
    %13 = arith.addf %10, %12 : vector<8x64xf32>
    %cst_11 = arith.constant 0.000000e+00 : f32
    %14 = vector.broadcast %cst_11 : f32 to vector<8x64xf32>
    %15 = arith.maximumf %13, %14 : vector<8x64xf32>
    %c0_12 = arith.constant 0 : index
    %c0_13 = arith.constant 0 : index
    %16 = vector.load %arg6[%c0_12, %c0_13] : memref<64x128xf32, #tpu.memory_space<vmem>>, vector<64x128xf32>
    %cst_14 = arith.constant dense<0.000000e+00> : vector<8x128xf32>
    %17 = tpu.matmul %15, %16, %cst_14 {dimension_numbers = #tpu.dot_dimension_numbers<[1], [0], [0], [1], [0, 0, 1, 1], [], []>} : vector<8x64xf32>, vector<64x128xf32>, vector<8x128xf32> -> vector<8x128xf32>
    %c0_15 = arith.constant 0 : index
    %c0_16 = arith.constant 0 : index
    %18 = vector.load %arg7[%c0_15, %c0_16] : memref<1x128xf32, #tpu.memory_space<vmem>>, vector<1x128xf32>
    %19 = vector.broadcast %18 : vector<1x128xf32> to vector<8x128xf32>
    %20 = arith.addf %17, %19 : vector<8x128xf32>
    %21 = arith.truncf %20 : vector<8x128xf32> to vector<8x128xbf16>
    %c0_17 = arith.constant 0 : index
    %c0_18 = arith.constant 0 : index
    %22 = vector.load %arg8[%c0_17, %c0_18] : memref<8x128xbf16, #tpu.memory_space<vmem>>, vector<8x128xbf16>
    tpu.vector_store %arg8[%c0_17, %c0_18], %21 {strides = array<i32>} : memref<8x128xbf16, #tpu.memory_space<vmem>>, vector<8x128xbf16>,
    return
  }
  func.func @transform_0(%arg0: i32) -> (i32, i32) {
    %c0_i32 = arith.constant 0 : i32
    %c0_i32_0 = arith.constant 0 : i32
    return %arg0, %c0_i32 : i32, i32
  }
  func.func @transform_1(%arg0: i32) -> (i32, i32) {
    %c0_i32 = arith.constant 0 : i32
    %c0_i32_0 = arith.constant 0 : i32
    %c0_i32_1 = arith.constant 0 : i32
    return %c0_i32, %c0_i32_0 : i32, i32
  }
  func.func @transform_2(%arg0: i32) -> (i32, i32) {
    %c0_i32 = arith.constant 0 : i32
    %c0_i32_0 = arith.constant 0 : i32
    %c0_i32_1 = arith.constant 0 : i32
    return %c0_i32, %c0_i32_0 : i32, i32
  }
  func.func @transform_3(%arg0: i32) -> (i32, i32) {
    %c0_i32 = arith.constant 0 : i32
    %c0_i32_0 = arith.constant 0 : i32
    %c0_i32_1 = arith.constant 0 : i32
    return %c0_i32, %c0_i32_0 : i32, i32
  }
  func.func @transform_4(%arg0: i32) -> (i32, i32) {
    %c0_i32 = arith.constant 0 : i32
    %c0_i32_0 = arith.constant 0 : i32
    %c0_i32_1 = arith.constant 0 : i32
    return %c0_i32, %c0_i32_0 : i32, i32
  }
  func.func @transform_5(%arg0: i32) -> (i32, i32) {
    %c0_i32 = arith.constant 0 : i32
    %c0_i32_0 = arith.constant 0 : i32
    %c0_i32_1 = arith.constant 0 : i32
    return %c0_i32, %c0_i32_0 : i32, i32
  }
  func.func @transform_6(%arg0: i32) -> (i32, i32) {
    %c0_i32 = arith.constant 0 : i32
    %c0_i32_0 = arith.constant 0 : i32
    %c0_i32_1 = arith.constant 0 : i32
    return %c0_i32, %c0_i32_0 : i32, i32
  }
  func.func @transform_7(%arg0: i32) -> (i32, i32) {
    %c0_i32 = arith.constant 0 : i32
    %c0_i32_0 = arith.constant 0 : i32
    return %arg0, %c0_i32 : i32, i32
  }
}

</mosaic_0001>

<bundles_post_ra>
// kernel: tpu_custom_call.1
= control target key start
LH: loop header
LB: loop body
LE: loop exit
PB: predicated region body
PF: predicated region fallthrough
CT: control target
= control target key end

     0   :  { %12 = vsyncpa [#allocation3], 0  ;;  %s1104_s0 = inlined_call_operand.vmem [shape: f32[8,784], index: 0, kind: input, shape index: {}]   ;;  %s1105_s1 = inlined_call_operand.hbm [shape: bf16[784,128], index: 1, kind: input, shape index: {}]   ;;  %s1106_s2 = inlined_call_operand.vmem [shape: f32[1,128], index: 2, kind: input, shape index: {}]   ;;  %s1107_s3 = inlined_call_operand.vmem [shape: f32[128,64], index: 3, kind: input, shape index: {}]   ;;  %s1108_s4 = inlined_call_operand.vmem [shape: f32[1,64], index: 4, kind: input, shape index: {}]   ;;  %s1109_s5 = inlined_call_operand.vmem [shape: f32[64,128], index: 5, kind: input, shape index: {}]   ;;  %s1110_s6 = inlined_call_operand.vmem [shape: f32[1,128], index: 6, kind: input, shape index: {}]   ;;  %s1111_s7 = inlined_call_operand.hbm [shape: bf16[8,128], index: 7, kind: output, shape index: {}]  }
   0x1   :  { %13 = vsyncpa [#allocation4], 0  ;;  %s20_s26 = sshll.u32 %s1105_s1, 4  ;;  %s952_s27 = smov [#allocation2]   ;;  %s21_s26 = int_to_ptr.hbm [resolvable:$true] %s20_s26 }
   0x2   :  { %s22_s28 = sshll.u32 %s952_s27, 4  ;;  %s953_s29 = smov 64   ;;  %s23_s28 = int_to_ptr.vmem [resolvable:$true] %s22_s28 }
   0x3   :  { %s954_s30 = smov 4  }
   0x4   :  { %28 = dma.hbm_to_vmem [thread:$0]  %s21_s26, 6272, %s23_s28, [#allocation3], %s953_s29, %s953_s29, %s954_s30  }
   0x5   :  { %948 = dma.done.wait [#allocation3], 6272  }
   0x6   :  { %949 = vsyncadd [#allocation3], 4294961024  ;;  %v851_v0 = vld [vmem:[#allocation2 + $0x38] sm:$0xff]  ;;  %v850_v3 = vld [vmem:[#allocation2 + $0x30] sm:$0xff]  ;;  %vm454_vm0 = vcmask 130048   ;;  %vm603_vm1 = vcmask 523264  }
   0x7   :  { %v859_v1 = vld [vmem:[#allocation2 + $0x78] sm:$0xff]  ;;  %458 = vmatpush.bf16.msra.mxu0 %v851_v0  ;;  %v858_v4 = vld [vmem:[#allocation2 + $0x70] sm:$0xff]  ;;  %v849_v8 = vld [vmem:[#allocation2 + $0x28] sm:$0xff]  ;;  %s955_s23 = smov [#allocation5]  }
   0x8   :  { %v867_v2 = vld [vmem:[#allocation2 + $0xb8] sm:$0xff]  ;;  %471 = vmatpush.bf16.msra.mxu1 %v859_v1  ;;  %v866_v5 = vld [vmem:[#allocation2 + $0xb0] sm:$0xff]  ;;  %v857_v9 = vld [vmem:[#allocation2 + $0x68] sm:$0xff]  ;;  %s634_s24 = sshll.u32 %s955_s23, 4  ;;  %s635_s24 = int_to_ptr.vmem [resolvable:$true] %s634_s24 }
   0x9   :  { %484 = vmatpush.bf16.msra.mxu2 %v867_v2  ;;  %v875_v6 = vld [vmem:[#allocation2 + $0xf8] sm:$0xff]  ;;  %v874_v7 = vld [vmem:[#allocation2 + $0xf0] sm:$0xff]  ;;  %v865_v10 = vld [vmem:[#allocation2 + $0xa8] sm:$0xff] }
   0xa   :  { %497 = vmatpush.bf16.msra.mxu3 %v875_v6  ;;  %v873_v11 = vld [vmem:[#allocation2 + $0xe8] sm:$0xff]  ;;  %v848_v12 = vld [vmem:[#allocation2 + $0x20] sm:$0xff]  ;;  %v847_v16 = vld [vmem:[#allocation2 + $0x18] sm:$0xff] }
   0xb   :  { %459 = vmatpush.bf16.msra.mxu0 %v850_v3  ;;  %v856_v13 = vld [vmem:[#allocation2 + $0x60] sm:$0xff]  ;;  %v855_v17 = vld [vmem:[#allocation2 + $0x58] sm:$0xff]  ;;  %v846_v20 = vld [vmem:[#allocation2 + $0x10] sm:$0xff] }
   0xc   :  { %472 = vmatpush.bf16.msra.mxu1 %v858_v4  ;;  %v864_v14 = vld [vmem:[#allocation2 + $0xa0] sm:$0xff]  ;;  %v863_v18 = vld [vmem:[#allocation2 + $0x98] sm:$0xff]  ;;  %v854_v21 = vld [vmem:[#allocation2 + $0x50] sm:$0xff] }
   0xd   :  { %485 = vmatpush.bf16.msra.mxu2 %v866_v5  ;;  %v872_v15 = vld [vmem:[#allocation2 + $0xe0] sm:$0xff]  ;;  %v871_v19 = vld [vmem:[#allocation2 + $0xd8] sm:$0xff]  ;;  %v862_v22 = vld [vmem:[#allocation2 + $0x90] sm:$0xff] }
   0xe   :  { %498 = vmatpush.bf16.msra.mxu3 %v874_v7  ;;  %v870_v23 = vld [vmem:[#allocation2 + $0xd0] sm:$0xff]  ;;  %v845_v24 = vld [vmem:[#allocation2 + $0x8] sm:$0xff]  ;;  %v844_v27 = vld [vmem:[#allocation2] sm:$0xff] }
   0xf   :  { %460 = vmatpush.bf16.msra.mxu0 %v849_v8  ;;  %v853_v25 = vld [vmem:[#allocation2 + $0x48] sm:$0xff]  ;;  %v852_v29 = vld [vmem:[#allocation2 + $0x40] sm:$0xff]  ;;  %v883_v32 = vld [vmem:[#allocation2 + $0x138] sm:$0xff] }
  0x10   :  { %473 = vmatpush.bf16.msra.mxu1 %v857_v9  ;;  %v861_v26 = vld [vmem:[#allocation2 + $0x88] sm:$0xff]  ;;  %v44_v30 = vld [vmem:[%s1104_s0] sm:$0xff]  ;;  %v891_v33 = vld [vmem:[#allocation2 + $0x178] sm:$0xff] }
  0x11   :  { %486 = vmatpush.bf16.msra.mxu2 %v865_v10  ;;  %v869_v28 = vld [vmem:[#allocation2 + $0xc8] sm:$0xff]  ;;  %v860_v34 = vld [vmem:[#allocation2 + $0x80] sm:$0xff]  ;;  %v46_v35 = vld [vmem:[%s1104_s0 + $0x10] sm:$0xff]  ;;  %v51_v36 = vpack.c.bf16 %v44_v30, %v44_v30 }
  0x12   :  { %499 = vmatpush.bf16.msra.mxu3 %v873_v11  ;;  %v45_v31 = vld [vmem:[%s1104_s0 + $0x8] sm:$0xff]  ;;  %v868_v38 = vld [vmem:[#allocation2 + $0xc0] sm:$0xff]  ;;  %v47_v40 = vld [vmem:[%s1104_s0 + $0x18] sm:$0xff]  ;;  %v53_v43 = vpack.c.bf16 %v46_v35, %v46_v35 }
  0x13   :  { %461 = vmatpush.bf16.msra.mxu0 %v848_v12  ;;  %v52_v37 = vpack.c.bf16 %v45_v31, %v45_v31  ;;  %v892_v39 = vld [vmem:[#allocation2 + $0x180] sm:$0xff]  ;;  %v882_v41 = vld [vmem:[#allocation2 + $0x130] sm:$0xff]  ;;  %v54_v44 = vpack.c.bf16 %v47_v40, %v47_v40  ;;  %v881_v45 = vld [vmem:[#allocation2 + $0x128] sm:$0xff] }
  0x14   :  { %474 = vmatpush.bf16.msra.mxu1 %v856_v13  ;;  %v890_v42 = vld [vmem:[#allocation2 + $0x170] sm:$0xff]  ;;  %v889_v46 = vld [vmem:[#allocation2 + $0x168] sm:$0xff]  ;;  %v880_v47 = vld [vmem:[#allocation2 + $0x120] sm:$0xff] }
  0x15   :  { %487 = vmatpush.bf16.msra.mxu2 %v864_v14  ;;  %v888_v48 = vld [vmem:[#allocation2 + $0x160] sm:$0xff]  ;;  %v879_v49 = vld [vmem:[#allocation2 + $0x118] sm:$0xff]  ;;  %v50_v51 = vld [vmem:[%s1104_s0 + $0x30] sm:$0xff] }
  0x16   :  { %500 = vmatpush.bf16.msra.mxu3 %v872_v15  ;;  %v887_v50 = vld [vmem:[#allocation2 + $0x158] sm:$0xff]  ;;  %v878_v52 = vld [vmem:[#allocation2 + $0x110] sm:$0xff]  ;;  %v57_v54 = vpack.c.bf16 %v50_v51, %v50_v51  ;;  %v877_v55 = vld [vmem:[#allocation2 + $0x108] sm:$0xff] }
  0x17   :  { %462 = vmatpush.bf16.msra.mxu0 %v847_v16  ;;  %v886_v53 = vld [vmem:[#allocation2 + $0x150] sm:$0xff]  ;;  %v885_v56 = vld [vmem:[#allocation2 + $0x148] sm:$0xff]  ;;  %v876_v57 = vld [vmem:[#allocation2 + $0x100] sm:$0xff] }
  0x18   :  { %475 = vmatpush.bf16.msra.mxu1 %v855_v17  ;;  %v884_v58 = vld [vmem:[#allocation2 + $0x140] sm:$0xff]  ;;  %v49_v60 = vld [vmem:[%s1104_s0 + $0x28] sm:$0xff]  ;;  %v565_v63 = vld [vmem:[%s1107_s3 + $0x78] sm:$0xff] }
  0x19   :  { %488 = vmatpush.bf16.msra.mxu2 %v863_v18  ;;  %v48_v59 = vld [vmem:[%s1104_s0 + $0x20] sm:$0xff]  ;;  %v56_v62 = vpack.c.bf16 %v49_v60, %v49_v60  ;;  %v564_v0 = vld [vmem:[%s1107_s3 + $0x70] sm:$0xff]  ;;  %v563_v1 = vld [vmem:[%s1107_s3 + $0x68] sm:$0xff] }
  0x1a   :  { %501 = vmatpush.bf16.msra.mxu3 %v871_v19  ;;  %v55_v61 = vpack.c.bf16 %v48_v59, %v48_v59  ;;  %v562_v2 = vld [vmem:[%s1107_s3 + $0x60] sm:$0xff]  ;;  %v561_v3 = vld [vmem:[%s1107_s3 + $0x58] sm:$0xff]  ;;  %v560_v4 = vld [vmem:[%s1107_s3 + $0x50] sm:$0xff] }
  0x1b   :  { %463 = vmatpush.bf16.msra.mxu0 %v846_v20  ;;  %v559_v5 = vld [vmem:[%s1107_s3 + $0x48] sm:$0xff]  ;;  %v558_v6 = vld [vmem:[%s1107_s3 + $0x40] sm:$0xff]  ;;  %v557_v7 = vld [vmem:[%s1107_s3 + $0x38] sm:$0xff] }
  0x1c   :  { %476 = vmatpush.bf16.msra.mxu1 %v854_v21  ;;  %v556_v8 = vld [vmem:[%s1107_s3 + $0x30] sm:$0xff]  ;;  %v555_v9 = vld [vmem:[%s1107_s3 + $0x28] sm:$0xff]  ;;  %v554_v10 = vld [vmem:[%s1107_s3 + $0x20] sm:$0xff] }
  0x1d   :  { %489 = vmatpush.bf16.msra.mxu2 %v862_v22  ;;  %v553_v11 = vld [vmem:[%s1107_s3 + $0x18] sm:$0xff]  ;;  %v552_v14 = vld [vmem:[%s1107_s3 + $0x10] sm:$0xff]  ;;  %v551_v15 = vld [vmem:[%s1107_s3 + $0x8] sm:$0xff] }
  0x1e   :  { %502 = vmatpush.bf16.msra.mxu3 %v870_v23  ;;  %v550_v16 = vld [vmem:[%s1107_s3] sm:$0xff]  ;;  %v598_v17 = vld [vmem:[%s1109_s5 + $0x38] sm:$0xff]  ;;  %v597_v18 = vld [vmem:[%s1109_s5 + $0x30] sm:$0xff] }
  0x1f   :  { %464 = vmatpush.bf16.msra.mxu0 %v845_v24  ;;  %v596_v21 = vld [vmem:[%s1109_s5 + $0x28] sm:$0xff]  ;;  %v595_v24 = vld [vmem:[%s1109_s5 + $0x20] sm:$0xff] }
  0x20   :  { %477 = vmatpush.bf16.msra.mxu1 %v853_v25  ;;  %v897_v25 = vld [vmem:[%s1106_s2] ss:$0 sm:$0xff] }
  0x21   :  { %490 = vmatpush.bf16.msra.mxu2 %v861_v26  ;;  %v594_v26 = vld [vmem:[%s1109_s5 + $0x18] sm:$0xff] }
  0x22   :  { %503 = vmatpush.bf16.msra.mxu3 %v869_v28 }
  0x23   :  { %465 = vmatpush.bf16.msra.mxu0 %v844_v27  ;;  %v593_v27 = vld [vmem:[%s1109_s5 + $0x10] sm:$0xff] }
  0x24   :  { %478 = vmatpush.bf16.msra.mxu1 %v852_v29 }
  0x25   :  { %491 = vmatpush.bf16.msra.mxu2 %v860_v34 }
  0x26   :  { %466 = vmatmul.bf16.vlgmr.msra.gmra.mxu0 %v51_v36  ;;  %504 = vmatpush.bf16.msra.mxu3 %v868_v38 }
  0x27   :  { %510 = vmatpush.bf16.msrb.mxu0 %v883_v32  ;;  %479 = vmatmul.bf16.vlgmr.msra.gmra.mxu1 %v52_v37 }
  0x28   :  { %523 = vmatpush.bf16.msrb.mxu1 %v891_v33  ;;  %492 = vmatmul.bf16.vlgmr.msra.gmra.mxu2 %v53_v43 }
  0x29   :  { %543 = vmatpush.bf16.msrb.mxu2 %v892_v39  ;;  %505 = vmatmul.bf16.vlgmr.msra.gmra.mxu3 %v54_v44  ;;  %v592_v44 = vld [vmem:[%s1109_s5 + $0x8] sm:$0xff] }
  0x2a   :  { %570 = vmatpush.msrb.mxu3 %v565_v63 }
  0x2b   :  { %511 = vmatpush.bf16.msrb.mxu0 %v882_v41 }
  0x2c   :  { %524 = vmatpush.bf16.msrb.mxu1 %v890_v42  ;;  %571 = vmatpush.msrb.mxu3 %v564_v0 }
  0x2d   :  { %615 = vmatpush.msra.mxu2 %v598_v17 }
  0x2e   :  { %572 = vmatpush.msrb.mxu3 %v563_v1 }
  0x2f   :  { %512 = vmatpush.bf16.msrb.mxu0 %v881_v45  ;;  %616 = vmatpush.msra.mxu2 %v597_v18  ;;  %v591_v45 = vld [vmem:[%s1109_s5] sm:$0xff]  ;;  %s636_s5 = sshll.u32 %s1111_s7, 4  ;;  %s637_s5 = int_to_ptr.hbm [resolvable:$true] %s636_s5 }
  0x30   :  { %525 = vmatpush.bf16.msrb.mxu1 %v889_v46  ;;  %573 = vmatpush.msrb.mxu3 %v562_v2  ;;  %v898_v46 = vld [vmem:[%s1108_s4] ss:$0 sm:$0xff] }
  0x31   :  { %617 = vmatpush.msra.mxu2 %v596_v21 }
  0x32   :  { %574 = vmatpush.msrb.mxu3 %v561_v3 }
  0x33   :  { %513 = vmatpush.bf16.msrb.mxu0 %v880_v47  ;;  %618 = vmatpush.msra.mxu2 %v595_v24 }
  0x34   :  { %526 = vmatpush.bf16.msrb.mxu1 %v888_v48  ;;  %575 = vmatpush.msrb.mxu3 %v560_v4 }
  0x35   :  { %619 = vmatpush.msra.mxu2 %v594_v26 }
  0x36   :  { %576 = vmatpush.msrb.mxu3 %v559_v5 }
  0x37   :  { %514 = vmatpush.bf16.msrb.mxu0 %v879_v49  ;;  %620 = vmatpush.msra.mxu2 %v593_v27 }
  0x38   :  { %527 = vmatpush.bf16.msrb.mxu1 %v887_v50  ;;  %842 = vmatmul.msk.bf16.vlgmr.msrb.gmra.mxu2 %vm454_vm0, %v57_v54  ;;  %v899_v50 = vld [vmem:[%s1110_s6] ss:$0 sm:$0xff] }
  0x39   :  { %577 = vmatpush.msrb.mxu3 %v558_v6  ;;  %621 = vmatpush.msra.mxu2 %v592_v44 }
  0x3b   :  { %515 = vmatpush.bf16.msrb.mxu0 %v878_v52  ;;  %578 = vmatpush.msrb.mxu3 %v557_v7 }
  0x3c   :  { %528 = vmatpush.bf16.msrb.mxu1 %v886_v53  ;;  %622 = vmatpush.msra.mxu2 %v591_v45 }
  0x3d   :  { %579 = vmatpush.msrb.mxu3 %v556_v8 }
  0x3f   :  { %516 = vmatpush.bf16.msrb.mxu0 %v877_v55  ;;  %580 = vmatpush.msrb.mxu3 %v555_v9 }
  0x40   :  { %529 = vmatpush.bf16.msrb.mxu1 %v885_v56 }
  0x41   :  { %581 = vmatpush.msrb.mxu3 %v554_v10 }
  0x43   :  { %517 = vmatpush.bf16.msrb.mxu0 %v876_v57  ;;  %582 = vmatpush.msrb.mxu3 %v553_v11 }
  0x44   :  { %530 = vmatpush.bf16.msrb.mxu1 %v884_v58 }
  0x45   :  { %583 = vmatpush.msrb.mxu3 %v552_v14 }
  0x46   :  { %518 = vmatmul.bf16.vlgmr.msrb.gmra.mxu0 %v55_v61 }
  0x47   :  { %531 = vmatmul.bf16.vlgmr.msrb.gmra.mxu1 %v56_v62  ;;  %584 = vmatpush.msrb.mxu3 %v551_v15 }
  0x49   :  { %585 = vmatpush.msrb.mxu3 %v550_v16 }
  0xa3   :  { %v467_v12 = vpop.f32.mrf.mxu0 }
  0xa4   :  { %v480_v13 = vpop.f32.mrf.mxu1  ;;  %v468_v28 = vadd.f32 %v897_v25, %v467_v12 }
  0xa6   :  { %v481_v31 = vadd.f32 %v480_v13, %v468_v28 }
  0xab   :  { %v469_v19 = vpop.f32.mrf.mxu0  ;;  %v493_v22 = vpop.f32.mrf.mxu2 }
  0xac   :  { %v482_v20 = vpop.f32.mrf.mxu1  ;;  %v506_v23 = vpop.f32.mrf.mxu3  ;;  %v494_v32 = vadd.f32 %v493_v22, %v481_v31 }
  0xae   :  { %v507_v34 = vadd.f32 %v506_v23, %v494_v32 }
  0xb3   :  { %v495_v29 = vpop.f32.mrf.mxu2 }
  0xb4   :  { %v508_v30 = vpop.f32.mrf.mxu3 }
  0xbb   :  { %v545_v33 = vpop.f32.mrf.mxu2 }
  0xc3   :  { %v519_v35 = vpop.f32.mrf.mxu0  ;;  %v547_v39 = vpop.f32.mrf.mxu2 }
  0xc4   :  { %v532_v36 = vpop.f32.mrf.mxu1  ;;  %v520_v37 = vadd.f32 %v519_v35, %v507_v34 }
  0xc6   :  { %v533_v38 = vadd.f32 %v532_v36, %v520_v37 }
  0xc8   :  { %v546_v40 = vadd.f32 %v545_v33, %v533_v38 }
  0xca   :  { %v549_v41 = vmax.f32 %v546_v40, 0.0 }
  0xcb   :  { %v521_v42 = vpop.f32.mrf.mxu0 }
  0xcc   :  { %v534_v43 = vpop.f32.mrf.mxu1  ;;  %586 = vmatmul.f32.vlgmr.msrb.gmra.mxu3 %v549_v41 }
 0x14f   :  { %v587_v47 = vpop.f32.mrf.mxu3 }
 0x150   :  { %v588_v48 = vadd.f32 %v898_v46, %v587_v47 }
 0x152   :  { %v590_v49 = vmax.f32 %v588_v48, 0.0 }
 0x154   :  { %843 = vmatmul.msk.f32.vlgmr.msra.gmra.mxu2 %vm603_vm1, %v590_v49 }
 0x1d7   :  { %v624_v51 = vpop.f32.mrf.mxu2 }
 0x1d8   :  { %v625_v52 = vadd.f32 %v899_v50, %v624_v51 }
 0x1da   :  { %v627_v53 = vpack.c.bf16 %v625_v52, %v625_v52 }
 0x1dc   :  { %628 = vst [vmem:[#allocation5] sm:$0xf] %v627_v53 }
 0x1dd   :  { %639 = dma.vmem_to_hbm [thread:$0]  %s635_s24, 64, %s637_s5, [#allocation4]  }
 0x1de   :  { %950 = dma.done.wait [#allocation4], 64  }
 0x1df   :  { %951 = vsyncadd [#allocation4], 4294967232 }
 0x1e0   :  { %644 = vsyncpa [#allocation3], 1 }
 0x1e1   :  { %645 = vsyncpa [#allocation4], 1 }

</bundles_post_ra>
